<compile_context>
chip_gen: v5e
topology: v5e:2x2
jax: 0.10.0
libtpu: 0.0.40
codegen_flags: <defaults>
</compile_context>

<pallas_src>
import math
from functools import partial

import jax
import jax.numpy as jnp
from jax.experimental import pallas as pl
from jax.experimental.pallas import tpu as pltpu


def _label_smoothing_kernel(x_ref, t_ref, o_ref, *, padding_idx, confidence,
                            fill, ent_row):
    x = x_ref[...]                      # (TM, Vp) f32 log-probs (0-padded cols)
    t = t_ref[...]                      # (TM, 1)  int32 targets

    # weights of the smoothed target distribution (target scatter only;
    # padding column / padded rows handled below without per-element wheres)
    col = jax.lax.broadcasted_iota(jnp.int32, x.shape, 1)
    w = jnp.where(col == t, confidence, fill)            # (TM, Vp)

    # cross term  sum_j td[n,j] * x[n,j]
    row_cross = jnp.sum(w * x, axis=-1, keepdims=True)   # (TM, 1)
    # remove the padding column (its true weight is 0, not `fill`);
    # padded columns beyond V have x == 0 and already contribute nothing.
    row_cross = row_cross - fill * x[:, padding_idx:padding_idx + 1]

    # per-row KL contribution: entropy constant minus cross term;
    # rows whose target is padding_idx contribute exactly 0.
    row_loss = jnp.where(t == padding_idx, 0.0, ent_row - row_cross)  # (TM,1)
    block_partial = jnp.sum(row_loss)

    # lane-dense, unmasked full-block store of this group's partial sum
    o_ref[...] = jnp.broadcast_to(block_partial, o_ref.shape).astype(jnp.float32)


def label_smoothing_loss(x, target, *, size, padding_idx, smoothing,
                         row_tile=None):
    """x: (N, size) float32 log-probs; target: (N,) integer classes.

    Returns the scalar KLDivLoss(reduction='sum') against the label-smoothed
    target distribution (matches the PyTorch LabelSmoothing module forward).
    """
    N, V = x.shape
    assert V == size

    confidence = 1.0 - smoothing
    # NOTE: divides by zero when size == 2, exactly like the PyTorch module.
    fill = smoothing / (size - 2)

    # Entropy of one non-padding row's true_dist, folded to a compile-time
    # constant (0*log(0) := 0 handled at Python level).
    ent_row = 0.0
    if confidence > 0.0:
        ent_row += confidence * math.log(confidence)
    if fill > 0.0:
        ent_row += (size - 2) * fill * math.log(fill)

    # Lane-dense vocab axis.
    V_pad = max(128, ((V + 127) // 128) * 128)

    # Adaptive row tile: target ~2 MiB f32 x-blocks, multiple of 8, capped,
    # and never (much) larger than the problem itself.
    if row_tile is None:
        rt = (2 * 1024 * 1024) // (4 * V_pad)
        rt = max(8, min(512, (rt // 8) * 8))
        rt = min(rt, ((N + 7) // 8) * 8)
        row_tile = max(8, rt)
    assert row_tile % 8 == 0

    N_pad = ((N + row_tile - 1) // row_tile) * row_tile
    G = N_pad // row_tile

    # Pad: extra columns are zero log-probs (weight*0 == 0 contribution),
    # extra rows get target == padding_idx (contribute exactly 0).
    x_p = jnp.pad(x.astype(jnp.float32), ((0, N_pad - N), (0, V_pad - V)))
    t_p = jnp.pad(target.astype(jnp.int32), (0, N_pad - N),
                  constant_values=padding_idx).reshape(N_pad, 1)

    kernel = partial(_label_smoothing_kernel, padding_idx=padding_idx,
                     confidence=confidence, fill=fill, ent_row=ent_row)

    out = pl.pallas_call(
        kernel,
        out_shape=jax.ShapeDtypeStruct((G, 8, 128), jnp.float32),
        grid_spec=pltpu.PrefetchScalarGridSpec(
            num_scalar_prefetch=0,
            grid=(G,),
            in_specs=[
                pl.BlockSpec((row_tile, V_pad), lambda i: (i, 0)),
                pl.BlockSpec((row_tile, 1), lambda i: (i, 0)),
            ],
            out_specs=pl.BlockSpec((1, 8, 128), lambda i: (i, 0, 0)),
        ),
        compiler_params=pltpu.CompilerParams(
            dimension_semantics=("parallel",)),
    )(x_p, t_p)

    # tiny cross-group reduction in the wrapper (per-group partials also keep
    # f32 accumulation error bounded for large N*V)
    return jnp.sum(out[:, 0, 0])


def _reference(x, target, *, size, padding_idx, smoothing):
    confidence = 1.0 - smoothing
    fill = smoothing / (size - 2)
    N, V = x.shape
    td = jnp.full((N, V), fill, dtype=jnp.float32)
    td = td.at[jnp.arange(N), target].set(confidence)
    td = td.at[:, padding_idx].set(0.0)
    td = jnp.where((target == padding_idx)[:, None], 0.0, td)
    safe = jnp.where(td > 0, td, 1.0)
    return jnp.sum(jnp.where(td > 0, td * (jnp.log(safe) - x), 0.0))


if __name__ == "__main__":
    SIZE = 32          # vocab size (x.size(1))
    PADDING_IDX = 0
    SMOOTHING = 0.1
    N = 16             # number of tokens (batch * seq)

    key = jax.random.PRNGKey(0)
    kx, kt = jax.random.split(key)
    logits = jax.random.normal(kx, (N, SIZE), dtype=jnp.float32)
    x = jax.nn.log_softmax(logits, axis=-1)               # log-probs, as used
    target = jax.random.randint(kt, (N,), 0, SIZE, dtype=jnp.int32)
    # ensure at least one padding row to exercise the index_fill_ path
    target = target.at[3].set(PADDING_IDX)

    loss = label_smoothing_loss(x, target, size=SIZE, padding_idx=PADDING_IDX,
                                smoothing=SMOOTHING)
    loss = jax.block_until_ready(loss)

    ref = _reference(x, target, size=SIZE, padding_idx=PADDING_IDX,
                     smoothing=SMOOTHING)
    assert jnp.allclose(loss, ref, rtol=1e-5, atol=1e-5), (loss, ref)

    # TODO(synk): the PyTorch module also stashes self.true_dist; we only
    # return the loss (the stored tensor is never used in the forward value).
    print("KERNEL_OK")
</pallas_src>

<mosaic_0001>
module attributes {stable_mosaic.version = 11 : i64} {
  func.func @_label_smoothing_kernel(%arg0: i32, %arg1: memref<16x128xf32, #tpu.memory_space<vmem>>, %arg2: memref<16x1xi32, #tpu.memory_space<vmem>>, %arg3: memref<1x8x128xf32, #tpu.memory_space<vmem>>) attributes {dimension_semantics = [#tpu.dimension_semantics<parallel>], iteration_bounds = array<i64: 1>, scalar_prefetch = 0 : i64, scratch_operands = 0 : i64, tpu.core_type = #tpu.core_type<tc>, window_params = [{transform_indices = @transform_0, window_bounds = array<i64: 16, 128>}, {transform_indices = @transform_1, window_bounds = array<i64: 16, 1>}, {transform_indices = @transform_2, window_bounds = array<i64: 1, 8, 128>}]} {
    %c0 = arith.constant 0 : index
    %c0_0 = arith.constant 0 : index
    %0 = vector.load %arg1[%c0, %c0_0] : memref<16x128xf32, #tpu.memory_space<vmem>>, vector<16x128xf32>
    %c0_1 = arith.constant 0 : index
    %c0_2 = arith.constant 0 : index
    %1 = vector.load %arg2[%c0_1, %c0_2] : memref<16x1xi32, #tpu.memory_space<vmem>>, vector<16x1xi32>
    %2 = tpu.iota {dimensions = array<i32: 1>} : vector<16x128xi32>
    %3 = vector.broadcast %1 : vector<16x1xi32> to vector<16x128xi32>
    %4 = arith.cmpi eq, %2, %3 : vector<16x128xi32>
    %cst = arith.constant 0.899999976 : f32
    %cst_3 = arith.constant 0.00333333341 : f32
    %5 = vector.broadcast %cst : f32 to vector<16x128xf32>
    %6 = vector.broadcast %cst_3 : f32 to vector<16x128xf32>
    %7 = arith.select %4, %5, %6 : vector<16x128xi1>, vector<16x128xf32>
    %8 = arith.mulf %7, %0 : vector<16x128xf32>
    %cst_4 = arith.constant dense<0.000000e+00> : vector<16xf32>
    %9 = vector.multi_reduction <add>, %8, %cst_4 [1] : vector<16x128xf32> to vector<16xf32>
    %10 = vector.shape_cast %9 : vector<16xf32> to vector<16x1xf32>
    %11 = vector.extract_strided_slice %0 {offsets = [0, 0], sizes = [16, 1], strides = [1, 1]} : vector<16x128xf32> to vector<16x1xf32>
    %cst_5 = arith.constant 0.00333333341 : f32
    %12 = vector.broadcast %cst_5 : f32 to vector<16x1xf32>
    %13 = arith.mulf %12, %11 : vector<16x1xf32>
    %14 = arith.subf %10, %13 : vector<16x1xf32>
    %c0_i32 = arith.constant 0 : i32
    %15 = vector.broadcast %c0_i32 : i32 to vector<16x1xi32>
    %16 = arith.cmpi eq, %1, %15 : vector<16x1xi32>
    %cst_6 = arith.constant -0.665202737 : f32
    %17 = vector.broadcast %cst_6 : f32 to vector<16x1xf32>
    %18 = arith.subf %17, %14 : vector<16x1xf32>
    %cst_7 = arith.constant 0.000000e+00 : f32
    %19 = vector.broadcast %cst_7 : f32 to vector<16x1xf32>
    %20 = arith.select %16, %19, %18 : vector<16x1xi1>, vector<16x1xf32>
    %21 = vector.shape_cast %20 : vector<16x1xf32> to vector<1x16x1xf32>
    %cst_8 = arith.constant dense<0.000000e+00> : vector<1xf32>
    %22 = vector.multi_reduction <add>, %21, %cst_8 [1, 2] : vector<1x16x1xf32> to vector<1xf32>
    %23 = vector.shape_cast %22 : vector<1xf32> to vector<1x1x1xf32>
    %24 = vector.extract %23[0, 0, 0] : f32 from vector<1x1x1xf32>
    %25 = vector.broadcast %24 : f32 to vector<1x8x128xf32>
    %c0_9 = arith.constant 0 : index
    %c0_10 = arith.constant 0 : index
    %c0_11 = arith.constant 0 : index
    %26 = vector.load %arg3[%c0_9, %c0_10, %c0_11] : memref<1x8x128xf32, #tpu.memory_space<vmem>>, vector<1x8x128xf32>
    tpu.vector_store %arg3[%c0_9, %c0_10, %c0_11], %25 {strides = array<i32>} : memref<1x8x128xf32, #tpu.memory_space<vmem>>, vector<1x8x128xf32>,
    return
  }
  func.func @transform_0(%arg0: i32) -> (i32, i32) {
    %c0_i32 = arith.constant 0 : i32
    %c0_i32_0 = arith.constant 0 : i32
    return %arg0, %c0_i32 : i32, i32
  }
  func.func @transform_1(%arg0: i32) -> (i32, i32) {
    %c0_i32 = arith.constant 0 : i32
    %c0_i32_0 = arith.constant 0 : i32
    return %arg0, %c0_i32 : i32, i32
  }
  func.func @transform_2(%arg0: i32) -> (i32, i32, i32) {
    %c0_i32 = arith.constant 0 : i32
    %c0_i32_0 = arith.constant 0 : i32
    %c0_i32_1 = arith.constant 0 : i32
    return %arg0, %c0_i32, %c0_i32_0 : i32, i32, i32
  }
}

</mosaic_0001>

<bundles_post_ra>
// kernel: tpu_custom_call.1
= control target key start
LH: loop header
LB: loop body
LE: loop exit
PB: predicated region body
PF: predicated region fallthrough
CT: control target
= control target key end

     0   :  { %s140_s0 = inlined_call_operand.vmem [shape: f32[16,128], index: 0, kind: input, shape index: {}]   ;;  %s141_s1 = inlined_call_operand.vmem [shape: s32[16,1], index: 1, kind: input, shape index: {}]   ;;  %s142_s2 = inlined_call_operand.hbm [shape: f32[1,8,128], index: 2, kind: output, shape index: {}]  }
   0x1   :  { %v14_v0 = vld [vmem:[%s141_s1] sm:$0xff] }
   0x2   :  { %7 = vsyncpa [#allocation3], 0  ;;  %v107_v1 = vmov 0   ;;  %v15_v2 = vld [vmem:[%s141_s1 + $0x8] sm:$0xff]  ;;  %v16_v3 = vlaneseq  ;;  %v12_v6 = vld [vmem:[%s140_s0] sm:$0xff]  ;;  %vm38_vm2 = vcmp.eq.s32.totalorder %v14_v0, 0 }
   0x3   :  { %80 = vset.pattern.permute.xlu0 %v107_v1  ;;  %v108_v7 = vmov 0.0033333334   ;;  %v13_v11 = vld [vmem:[%s140_s0 + $0x8] sm:$0xff]  ;;  %v34_v14 = vmul.f32 0.0033333334, %v12_v6  ;;  %vm39_vm3 = vcmp.eq.s32.totalorder %v15_v2, 0 }
   0x4   :  { %19 = vperm.xlu0 %80, %v14_v0   ;;  %v17_v4 = vand.u32 127, %v16_v3  ;;  %v35_v18 = vmul.f32 0.0033333334, %v13_v11  ;;  %vm44_vm4 = vcmask 7168   ;;  %s109_s0 = smov [#allocation2]   ;;  %s66_s19 = sshll.u32 %s142_s2, 4  ;;  %s67_s19 = int_to_ptr.hbm [resolvable:$true] %s66_s19 }
   0x5   :  { %s64_s1 = sshll.u32 %s109_s0, 4  ;;  %s65_s1 = int_to_ptr.vmem [resolvable:$true] %s64_s1 }
   0xc   :  { %22 = vperm.xlu0 %80, %v15_v2  }
  0x76   :  { %v20_v5 = vpop.permute.xlu0 %19 }
  0x77   :  { %vm24_vm0 = vcmp.eq.s32.totalorder %v17_v4, %v20_v5 }
  0x78   :  { %v26_v8 = vsel %vm24_vm0, 0.9, %v108_v7 }
  0x79   :  { %v28_v9 = vmul.f32 %v26_v8, %v12_v6 }
  0x7b   :  { %30 = vadd.xlane.f32.xlu1 %v28_v9 }
  0x7e   :  { %v23_v10 = vpop.permute.xlu0 %22 }
  0x7f   :  { %vm25_vm1 = vcmp.eq.s32.totalorder %v17_v4, %v23_v10 }
  0x80   :  { %v27_v12 = vsel %vm25_vm1, 0.9, %v108_v7 }
  0x81   :  { %v29_v13 = vmul.f32 %v27_v12, %v13_v11 }
  0x83   :  { %32 = vadd.xlane.f32.xlu1 %v29_v13 }
  0xee   :  { %v31_v15 = vpop.xlane.xlu1 %30 }
  0xef   :  { %v36_v16 = vsub.f32 %v31_v15, %v34_v14 }
  0xf1   :  { %v40_v17 = vsub.f32 -0.66520274, %v36_v16 }
  0xf3   :  { %v42_v19 = vsel %vm38_vm2, 0.0, %v40_v17 }
  0xf4   :  { %v45_v24 = vsel %vm44_vm4, %v42_v19, 0.0 }
  0xf6   :  { %v33_v20 = vpop.xlane.xlu1 %32 }
  0xf7   :  { %v37_v21 = vsub.f32 %v33_v20, %v35_v18 }
  0xf9   :  { %v41_v22 = vsub.f32 -0.66520274, %v37_v21 }
  0xfb   :  { %v43_v23 = vsel %vm39_vm3, 0.0, %v41_v22 }
  0xfc   :  { %v46_v25 = vsel %vm44_vm4, %v43_v23, 0.0 }
  0xfd   :  { %v47_v26 = vadd.f32 %v46_v25, %v45_v24 }
  0xff   :  { %48 = vadd.xlane.f32.xlu2 %v47_v26 }
 0x172   :  { %v49_v27 = vpop.xlane.xlu2 %48 }
 0x173   :  { %v50_v28 = vrot.slane %v49_v27, 4 }
 0x175   :  { %v51_v29 = vadd.f32 %v50_v28, %v49_v27 }
 0x177   :  { %v52_v30 = vrot.slane %v51_v29, 2 }
 0x179   :  { %v53_v31 = vadd.f32 %v52_v30, %v51_v29 }
 0x17b   :  { %v54_v32 = vrot.slane %v53_v31, 1 }
 0x17d   :  { %v55_v33 = vadd.f32 %v54_v32, %v53_v31 }
 0x17f   :  { %75 = vpush %v55_v33 }
 0x1b0   :  { %s76_s20 = spop %75 }
 0x1b1   :  { %v57_v34 = vstv %s76_s20 }
 0x1b2   :  { %58 = vst [vmem:[#allocation2] sm:$0xff] %v57_v34 }
 0x1b3   :  { %69 = dma.vmem_to_hbm [thread:$0]  %s65_s1, 128, %s67_s19, [#allocation3]  }
 0x1b4   :  { %105 = dma.done.wait [#allocation3], 128  }
 0x1b5   :  { %106 = vsyncadd [#allocation3], 4294967168 }
 0x1b6   :  { %74 = vsyncpa [#allocation3], 1 }

</bundles_post_ra>
